<compile_context>
chip_gen: v5e
topology: v5e:2x2
jax: 0.10.0
libtpu: 0.0.40
codegen_flags: <defaults>
</compile_context>

<pallas_src>
import functools

import jax
import jax.numpy as jnp
from jax.experimental import pallas as pl
from jax.experimental.pallas import tpu as pltpu

EPS = 1e-5
MIB = 1024 * 1024


def _round_up(x, m):
    return (x + m - 1) // m * m


def _vmem_capacity_bytes():
    """Physical VMEM per TensorCore; conservative fallback if the query is unavailable."""
    try:
        cap = int(pltpu.get_tpu_info().vmem_capacity_bytes)
        if 16 * MIB <= cap <= 1024 * MIB:
            return cap
    except Exception:
        pass
    return 64 * MIB   # v7x-sized fallback: safe on every generation


def _linear(a, w_ref, b_ref):
    """bf16 MXU operands, f32 accumulation, f32 bias add."""
    return jnp.dot(a.astype(jnp.bfloat16), w_ref[...],
                   preferred_element_type=jnp.float32) + b_ref[...]


# ----------------------------------------------------------------------------------------------
# Fast path: everything resident in VMEM, single grid step.
# ----------------------------------------------------------------------------------------------
def dnn_resident_kernel(x_ref, w1, b1, g1, be1, w2, b2, g2, be2, w3, b3, o_ref,
                        *, batch_size, needs_mask):
    inv_b = jnp.float32(1.0 / batch_size)

    def bn_relu(h, g_ref, be_ref):
        hm = h
        if needs_mask:   # padded batch rows must not contribute to the batch statistics
            rows = jax.lax.broadcasted_iota(jnp.int32, (h.shape[0], 1), 0)
            hm = jnp.where(rows < batch_size, h, 0.0)
        mean = jnp.sum(hm, axis=0, keepdims=True) * inv_b
        var = jnp.sum(hm * hm, axis=0, keepdims=True) * inv_b - mean * mean
        out = (h - mean) * jax.lax.rsqrt(var + EPS) * g_ref[...] + be_ref[...]
        return jnp.maximum(out, 0.0)

    h1 = _linear(x_ref[...], w1, b1)
    h2 = _linear(bn_relu(h1, g1, be1), w2, b2)
    h3 = _linear(bn_relu(h2, g2, be2), w3, b3)
    o_ref[...] = jnp.maximum(h3, 0.0)


# ----------------------------------------------------------------------------------------------
# Streaming path: 3-phase BN over batch tiles, h1/h2 cached in VMEM (or recomputed as fallback).
# ----------------------------------------------------------------------------------------------
def make_streaming_kernel(*, batch_size, tile_m, num_tiles, needs_mask, use_cache):
    def kernel(x_ref, w1, b1, g1, be1, w2, b2, g2, be2, w3, b3, o_ref,
               sum1, sumsq1, sum2, sumsq2, *cache):
        h1_cache, h2_cache = cache if use_cache else (None, None)
        phase = pl.program_id(0)      # 0: BN1 stats, 1: BN2 stats, 2: apply + output
        tile = pl.program_id(1)       # batch tile
        inv_b = jnp.float32(1.0 / batch_size)
        row0 = pl.multiple_of(tile * tile_m, tile_m)

        def bn_relu(h, s_ref, ss_ref, g_ref, be_ref):
            # Training-mode BN: global batch mean / biased variance from streamed sums (f32).
            # TODO(synk): E[h^2]-E[h]^2 cancels badly if |mean| >> std; a centered second pass
            # over the cached activations would fix it at the cost of two extra phases.
            mean = s_ref[...] * inv_b
            var = ss_ref[...] * inv_b - mean * mean
            out = (h - mean) * jax.lax.rsqrt(var + EPS) * g_ref[...] + be_ref[...]
            return jnp.maximum(out, 0.0)

        def accumulate(h, s_ref, ss_ref):
            if needs_mask:            # mask work only exists when batch padding exists
                rows = row0 + jax.lax.broadcasted_iota(jnp.int32, (tile_m, 1), 0)
                h = jnp.where(rows < batch_size, h, 0.0)
            s_ref[...] += jnp.sum(h, axis=0, keepdims=True)
            ss_ref[...] += jnp.sum(h * h, axis=0, keepdims=True)

        @pl.when(jnp.logical_and(phase == 0, tile == 0))
        def _init():
            sum1[...] = jnp.zeros_like(sum1)
            sumsq1[...] = jnp.zeros_like(sumsq1)
            sum2[...] = jnp.zeros_like(sum2)
            sumsq2[...] = jnp.zeros_like(sumsq2)

        @pl.when(phase == 0)          # pass 1: layer 1, BN1 statistics, fill h1 cache
        def _phase0():
            h1 = _linear(x_ref[...], w1, b1)
            accumulate(h1, sum1, sumsq1)
            if use_cache:
                h1_cache[pl.ds(row0, tile_m), :] = h1

        @pl.when(phase == 1)          # pass 2: BN1 apply, layer 2, BN2 statistics, fill h2 cache
        def _phase1():
            h1 = (h1_cache[pl.ds(row0, tile_m), :] if use_cache
                  else _linear(x_ref[...], w1, b1))
            h2 = _linear(bn_relu(h1, sum1, sumsq1, g1, be1), w2, b2)
            accumulate(h2, sum2, sumsq2)
            if use_cache:
                h2_cache[pl.ds(row0, tile_m), :] = h2

        @pl.when(phase == 2)          # pass 3: BN2 apply, layer 3, output
        def _phase2():
            if use_cache:
                h2 = h2_cache[pl.ds(row0, tile_m), :]
            else:
                h1 = _linear(x_ref[...], w1, b1)
                h2 = _linear(bn_relu(h1, sum1, sumsq1, g1, be1), w2, b2)
            h3 = _linear(bn_relu(h2, sum2, sumsq2, g2, be2), w3, b3)
            o_ref[...] = jnp.maximum(h3, 0.0)

    return kernel


# ----------------------------------------------------------------------------------------------
# Wrapper / dispatch
# ----------------------------------------------------------------------------------------------
def batch_dnn_forward(x, params, *, tile_m=None, force_streaming=False, force_no_cache=False):
    (w1, b1, g1, be1, w2, b2, g2, be2, w3, b3) = params
    B, in_dim = x.shape
    H1, H2, out_dim = w1.shape[1], w2.shape[1], w3.shape[1]
    H1P, H2P, OUTP = _round_up(H1, 128), _round_up(H2, 128), _round_up(out_dim, 128)

    # Lane-dense padding of hidden / output features.  gamma is zero-padded so padded features
    # come out of BN+ReLU exactly 0, and the padded rows of the next weight are zero too.
    w1_p = jnp.pad(w1, ((0, 0), (0, H1P - H1))).astype(jnp.bfloat16)
    b1_p = jnp.pad(b1, ((0, 0), (0, H1P - H1)))
    g1_p = jnp.pad(g1, ((0, 0), (0, H1P - H1)))
    be1_p = jnp.pad(be1, ((0, 0), (0, H1P - H1)))
    w2_p = jnp.pad(w2, ((0, H1P - H1), (0, H2P - H2))).astype(jnp.bfloat16)
    b2_p = jnp.pad(b2, ((0, 0), (0, H2P - H2)))
    g2_p = jnp.pad(g2, ((0, 0), (0, H2P - H2)))
    be2_p = jnp.pad(be2, ((0, 0), (0, H2P - H2)))
    w3_p = jnp.pad(w3, ((0, H2P - H2), (0, OUTP - out_dim))).astype(jnp.bfloat16)
    b3_p = jnp.pad(b3, ((0, 0), (0, OUTP - out_dim)))
    params_p = (w1_p, b1_p, g1_p, be1_p, w2_p, b2_p, g2_p, be2_p, w3_p, b3_p)
    param_bytes = sum(int(a.size) * a.dtype.itemsize for a in params_p)

    cap = _vmem_capacity_bytes()
    budget = max(min(int(0.80 * cap), cap - 12 * MIB), 16 * MIB)

    # ------------------------- fully-resident fast path -------------------------
    B8 = _round_up(max(B, 8), 8)
    resident_ws = (2 * (B8 * in_dim * 2 + B8 * OUTP * 4)      # double-buffered x / out
                   + 2 * param_bytes                          # double-buffered resident params
                   + B8 * (H1P + H2P + OUTP) * 4              # f32 activations
                   + B8 * (in_dim + H1P + H2P) * 2)           # bf16 matmul operand copies
    if not force_streaming and resident_ws <= int(0.55 * cap):
        x_p = jnp.pad(x, ((0, B8 - B), (0, 0))).astype(jnp.bfloat16)
        out_p = pl.pallas_call(
            functools.partial(dnn_resident_kernel, batch_size=B, needs_mask=(B8 != B)),
            out_shape=jax.ShapeDtypeStruct((B8, OUTP), jnp.float32),
            grid_spec=pltpu.PrefetchScalarGridSpec(
                num_scalar_prefetch=0,
                grid=(1,),
                in_specs=[pl.BlockSpec((B8, in_dim), lambda i: (0, 0))]
                         + [pl.BlockSpec(a.shape, lambda i: (0, 0)) for a in params_p],
                out_specs=pl.BlockSpec((B8, OUTP), lambda i: (0, 0)),
            ),
            compiler_params=pltpu.CompilerParams(
                dimension_semantics=("arbitrary",),
                vmem_limit_bytes=int(min(max(2 * resident_ws, 32 * MIB), budget)),
            ),
            cost_estimate=pl.CostEstimate(
                flops=int(2 * B8 * (in_dim * H1P + H1P * H2P + H2P * OUTP)),
                transcendentals=int(2 * (H1P + H2P)),
                bytes_accessed=int(x_p.size * 2 + B8 * OUTP * 4 + param_bytes)),
        )(x_p, *params_p)
        return out_p[:B, :out_dim]

    # ------------------------- streaming 3-phase path -------------------------
    B_align = _round_up(max(B, 8), 8)
    candidates = ([min(_round_up(tile_m, 8), B_align)] if tile_m is not None
                  else [1024, 512, 256, 128, 64, 32, 16, 8])

    def stream_ws(tm, bpad, with_cache):
        ws = (2 * (tm * in_dim * 2 + tm * OUTP * 4)           # double-buffered x / out tiles
              + 2 * param_bytes                               # resident params (2 buffers)
              + tm * (H1P + H2P + OUTP) * 4                   # f32 intermediates
              + tm * (in_dim + H1P + H2P) * 2                 # bf16 matmul operand copies
              + 2 * (H1P + H2P) * 4)                          # stat accumulators
        if with_cache:
            ws += bpad * (H1P + H2P) * 4                      # whole-batch h1 / h2 caches
        return ws

    choice = None
    for with_cache in ((False,) if force_no_cache else (True, False)):
        for tm in candidates:
            tm = min(_round_up(tm, 8), B_align)
            bpad = _round_up(B, tm)
            if stream_ws(tm, bpad, with_cache) <= budget:
                choice = (tm, bpad, with_cache)
                break
        if choice is not None:
            break
    if choice is None:                                        # degenerate fallback
        tm = min(8, B_align)
        choice = (tm, _round_up(B, tm), False)
    TM, B_pad, use_cache = choice
    num_tiles = B_pad // TM
    needs_mask = B_pad != B

    x_p = jnp.pad(x, ((0, B_pad - B), (0, 0))).astype(jnp.bfloat16)

    if use_cache:
        # x is only consumed in phase 0; pinning its block index afterwards means no further
        # x DMAs in phases 1/2 (layer-1 is not recomputed either -- it comes from the cache).
        x_map = lambda p, i: (jnp.where(p == 0, i, num_tiles - 1), 0)
    else:
        x_map = lambda p, i: (i, 0)

    def const_spec(a):
        # Constant index_map: fetched once, resident in VMEM across the whole grid.
        # TODO(synk): pipeline_mode=pl.Buffered(1) would halve the resident-param footprint
        # (matters most on v7x's 64 MiB VMEM); kept at the default for portability.
        return pl.BlockSpec(a.shape, lambda p, i: (0, 0))

    in_specs = [pl.BlockSpec((TM, in_dim), x_map)] + [const_spec(a) for a in params_p]
    # Phase-gated writeback: the output block index only advances in phase 2, so phases 0/1
    # never flush a stale (TM, OUTP) tile to HBM.
    out_specs = pl.BlockSpec((TM, OUTP), lambda p, i: (jnp.where(p == 2, i, 0), 0))

    scratch = [pltpu.VMEM((1, H1P), jnp.float32), pltpu.VMEM((1, H1P), jnp.float32),
               pltpu.VMEM((1, H2P), jnp.float32), pltpu.VMEM((1, H2P), jnp.float32)]
    if use_cache:
        scratch += [pltpu.VMEM((B_pad, H1P), jnp.float32),
                    pltpu.VMEM((B_pad, H2P), jnp.float32)]

    if use_cache:
        flops = 2 * B_pad * (in_dim * H1P + H1P * H2P + H2P * OUTP)
        x_reads = 1
    else:
        flops = 2 * B_pad * (3 * in_dim * H1P + 2 * H1P * H2P + H2P * OUTP)
        x_reads = 3
    bytes_accessed = x_reads * x_p.size * 2 + B_pad * OUTP * 4 + param_bytes
    ws = stream_ws(TM, B_pad, use_cache)

    kernel = make_streaming_kernel(batch_size=B, tile_m=TM, num_tiles=num_tiles,
                                   needs_mask=needs_mask, use_cache=use_cache)

    out_p = pl.pallas_call(
        kernel,
        out_shape=jax.ShapeDtypeStruct((B_pad, OUTP), jnp.float32),
        grid_spec=pltpu.PrefetchScalarGridSpec(
            num_scalar_prefetch=0,
            grid=(3, num_tiles),              # (phase, batch tile); tiles innermost
            in_specs=in_specs,
            out_specs=out_specs,
            scratch_shapes=scratch,
        ),
        compiler_params=pltpu.CompilerParams(
            # BN couples the whole batch: phase-0/1 accumulators feed phases 1/2, so both grid
            # axes must run in order.
            # TODO(synk): on v7x the tile axis could be split across the two TensorCores with a
            # CMEM / core_barrier combine of sum/sumsq between phases for ~2x.
            dimension_semantics=("arbitrary", "arbitrary"),
            vmem_limit_bytes=int(min(max(2 * ws, 32 * MIB), budget)),
        ),
        cost_estimate=pl.CostEstimate(flops=int(flops),
                                      transcendentals=int(2 * (H1P + H2P)),
                                      bytes_accessed=int(bytes_accessed)),
    )(x_p, *params_p)

    return out_p[:B, :out_dim]


# ----------------------------------------------------------------------------------------------
# Parameters / reference
# ----------------------------------------------------------------------------------------------
def make_params(key, in_dim, h1, h2, out_dim):
    ks = jax.random.split(key, 6)

    def linear(kw, kb, fan_in, fan_out):
        bound = 1.0 / jnp.sqrt(fan_in)
        w = jax.random.uniform(kw, (fan_in, fan_out), jnp.float32, -bound, bound)
        b = jax.random.uniform(kb, (1, fan_out), jnp.float32, -bound, bound)
        return w, b

    w1, b1 = linear(ks[0], ks[1], in_dim, h1)
    w2, b2 = linear(ks[2], ks[3], h1, h2)
    w3, b3 = linear(ks[4], ks[5], h2, out_dim)
    # BatchNorm1d affine params: gamma=1, beta=0 (PyTorch default init)
    g1, be1 = jnp.ones((1, h1), jnp.float32), jnp.zeros((1, h1), jnp.float32)
    g2, be2 = jnp.ones((1, h2), jnp.float32), jnp.zeros((1, h2), jnp.float32)
    return (w1, b1, g1, be1, w2, b2, g2, be2, w3, b3)


def reference_forward(x, params):
    """Pure-JAX reference mirroring the kernel's precision policy:
    bf16 matmul operands, f32 accumulation, training-mode BatchNorm in f32."""
    (w1, b1, g1, be1, w2, b2, g2, be2, w3, b3) = params

    def dot(a, w):
        return jnp.dot(a.astype(jnp.bfloat16), w.astype(jnp.bfloat16),
                       preferred_element_type=jnp.float32)

    def bn_relu(h, g, be):
        m = jnp.mean(h, axis=0, keepdims=True)
        v = jnp.mean(h * h, axis=0, keepdims=True) - m * m      # biased batch variance
        return jnp.maximum((h - m) * jax.lax.rsqrt(v + EPS) * g + be, 0.0)

    h = bn_relu(dot(x, w1) + b1, g1, be1)
    h = bn_relu(dot(h, w2) + b2, g2, be2)
    return jnp.maximum(dot(h, w3) + b3, 0.0)


if __name__ == "__main__":
    key = jax.random.PRNGKey(0)
    kx1, kx2, kp = jax.random.split(key, 3)

    # small MNIST-like shapes
    in_dim, h1, h2, out_dim = 32, 64, 32, 10
    params = make_params(kp, in_dim, h1, h2, out_dim)

    # 1) small batch -> fully-resident single-invocation fast path
    x1 = jax.random.normal(kx1, (8, in_dim), jnp.float32)
    out1 = jax.block_until_ready(batch_dnn_forward(x1, params))
    ref1 = reference_forward(x1, params)
    assert out1.shape == (8, out_dim)
    assert bool(jnp.all(jnp.isfinite(out1)))
    assert jnp.allclose(out1, ref1, atol=2e-3, rtol=2e-3), "fast path mismatch vs reference"

    # 2) forced streaming path: 3 phases x 2 batch tiles, padded last tile, VMEM h1/h2 cache
    x2 = jax.random.normal(kx2, (24, in_dim), jnp.float32)
    ref2 = reference_forward(x2, params)
    out2 = jax.block_until_ready(
        batch_dnn_forward(x2, params, tile_m=16, force_streaming=True))
    assert out2.shape == (24, out_dim)
    assert bool(jnp.all(jnp.isfinite(out2)))
    assert jnp.allclose(out2, ref2, atol=2e-3, rtol=2e-3), "streaming path mismatch vs reference"

    # 3) streaming recompute fallback (no h1/h2 cache) -- the huge-batch escape hatch
    out3 = jax.block_until_ready(
        batch_dnn_forward(x2, params, tile_m=16, force_streaming=True, force_no_cache=True))
    assert jnp.allclose(out3, ref2, atol=2e-3, rtol=2e-3), "recompute path mismatch vs reference"

    print("KERNEL_OK")
</pallas_src>

<mosaic_0001>
module attributes {stable_mosaic.version = 11 : i64} {
  func.func @dnn_resident_kernel(%arg0: i32, %arg1: memref<8x32xbf16, #tpu.memory_space<vmem>>, %arg2: memref<32x128xbf16, #tpu.memory_space<vmem>>, %arg3: memref<1x128xf32, #tpu.memory_space<vmem>>, %arg4: memref<1x128xf32, #tpu.memory_space<vmem>>, %arg5: memref<1x128xf32, #tpu.memory_space<vmem>>, %arg6: memref<128x128xbf16, #tpu.memory_space<vmem>>, %arg7: memref<1x128xf32, #tpu.memory_space<vmem>>, %arg8: memref<1x128xf32, #tpu.memory_space<vmem>>, %arg9: memref<1x128xf32, #tpu.memory_space<vmem>>, %arg10: memref<128x128xbf16, #tpu.memory_space<vmem>>, %arg11: memref<1x128xf32, #tpu.memory_space<vmem>>, %arg12: memref<8x128xf32, #tpu.memory_space<vmem>>) attributes {dimension_semantics = [#tpu.dimension_semantics<arbitrary>], iteration_bounds = array<i64: 1>, scalar_prefetch = 0 : i64, scratch_operands = 0 : i64, tpu.core_type = #tpu.core_type<tc>, window_params = [{pipeline_mode = #tpu.pipeline_mode<synchronous>, transform_indices = @transform_0, window_bounds = array<i64: 8, 32>}, {pipeline_mode = #tpu.pipeline_mode<synchronous>, transform_indices = @transform_1, window_bounds = array<i64: 32, 128>}, {pipeline_mode = #tpu.pipeline_mode<synchronous>, transform_indices = @transform_2, window_bounds = array<i64: 1, 128>}, {pipeline_mode = #tpu.pipeline_mode<synchronous>, transform_indices = @transform_3, window_bounds = array<i64: 1, 128>}, {pipeline_mode = #tpu.pipeline_mode<synchronous>, transform_indices = @transform_4, window_bounds = array<i64: 1, 128>}, {pipeline_mode = #tpu.pipeline_mode<synchronous>, transform_indices = @transform_5, window_bounds = array<i64: 128, 128>}, {pipeline_mode = #tpu.pipeline_mode<synchronous>, transform_indices = @transform_6, window_bounds = array<i64: 1, 128>}, {pipeline_mode = #tpu.pipeline_mode<synchronous>, transform_indices = @transform_7, window_bounds = array<i64: 1, 128>}, {pipeline_mode = #tpu.pipeline_mode<synchronous>, transform_indices = @transform_8, window_bounds = array<i64: 1, 128>}, {pipeline_mode = #tpu.pipeline_mode<synchronous>, transform_indices = @transform_9, window_bounds = array<i64: 128, 128>}, {pipeline_mode = #tpu.pipeline_mode<synchronous>, transform_indices = @transform_10, window_bounds = array<i64: 1, 128>}, {pipeline_mode = #tpu.pipeline_mode<synchronous>, transform_indices = @transform_11, window_bounds = array<i64: 8, 128>}]} {
    %c0 = arith.constant 0 : index
    %c0_0 = arith.constant 0 : index
    %0 = vector.load %arg1[%c0, %c0_0] : memref<8x32xbf16, #tpu.memory_space<vmem>>, vector<8x32xbf16>
    %c0_1 = arith.constant 0 : index
    %c0_2 = arith.constant 0 : index
    %1 = vector.load %arg2[%c0_1, %c0_2] : memref<32x128xbf16, #tpu.memory_space<vmem>>, vector<32x128xbf16>
    %cst = arith.constant dense<0.000000e+00> : vector<8x128xf32>
    %2 = tpu.matmul %0, %1, %cst {dimension_numbers = #tpu.dot_dimension_numbers<[1], [0], [0], [1], [0, 0, 1, 1], [], []>} : vector<8x32xbf16>, vector<32x128xbf16>, vector<8x128xf32> -> vector<8x128xf32>
    %c0_3 = arith.constant 0 : index
    %c0_4 = arith.constant 0 : index
    %3 = vector.load %arg3[%c0_3, %c0_4] : memref<1x128xf32, #tpu.memory_space<vmem>>, vector<1x128xf32>
    %4 = vector.broadcast %3 : vector<1x128xf32> to vector<8x128xf32>
    %5 = arith.addf %2, %4 : vector<8x128xf32>
    %cst_5 = arith.constant dense<0.000000e+00> : vector<128xf32>
    %6 = vector.multi_reduction <add>, %5, %cst_5 [0] : vector<8x128xf32> to vector<128xf32>
    %7 = vector.shape_cast %6 : vector<128xf32> to vector<1x128xf32>
    %cst_6 = arith.constant 1.250000e-01 : f32
    %8 = vector.broadcast %cst_6 : f32 to vector<1x128xf32>
    %9 = arith.mulf %7, %8 : vector<1x128xf32>
    %10 = arith.mulf %5, %5 : vector<8x128xf32>
    %cst_7 = arith.constant dense<0.000000e+00> : vector<128xf32>
    %11 = vector.multi_reduction <add>, %10, %cst_7 [0] : vector<8x128xf32> to vector<128xf32>
    %12 = vector.shape_cast %11 : vector<128xf32> to vector<1x128xf32>
    %cst_8 = arith.constant 1.250000e-01 : f32
    %13 = vector.broadcast %cst_8 : f32 to vector<1x128xf32>
    %14 = arith.mulf %12, %13 : vector<1x128xf32>
    %15 = arith.mulf %9, %9 : vector<1x128xf32>
    %16 = arith.subf %14, %15 : vector<1x128xf32>
    %17 = vector.broadcast %9 : vector<1x128xf32> to vector<8x128xf32>
    %18 = arith.subf %5, %17 : vector<8x128xf32>
    %cst_9 = arith.constant 9.99999974E-6 : f32
    %19 = vector.broadcast %cst_9 : f32 to vector<1x128xf32>
    %20 = arith.addf %16, %19 : vector<1x128xf32>
    %21 = math.rsqrt %20 : vector<1x128xf32>
    %22 = vector.broadcast %21 : vector<1x128xf32> to vector<8x128xf32>
    %23 = arith.mulf %18, %22 : vector<8x128xf32>
    %c0_10 = arith.constant 0 : index
    %c0_11 = arith.constant 0 : index
    %24 = vector.load %arg4[%c0_10, %c0_11] : memref<1x128xf32, #tpu.memory_space<vmem>>, vector<1x128xf32>
    %25 = vector.broadcast %24 : vector<1x128xf32> to vector<8x128xf32>
    %26 = arith.mulf %23, %25 : vector<8x128xf32>
    %c0_12 = arith.constant 0 : index
    %c0_13 = arith.constant 0 : index
    %27 = vector.load %arg5[%c0_12, %c0_13] : memref<1x128xf32, #tpu.memory_space<vmem>>, vector<1x128xf32>
    %28 = vector.broadcast %27 : vector<1x128xf32> to vector<8x128xf32>
    %29 = arith.addf %26, %28 : vector<8x128xf32>
    %cst_14 = arith.constant 0.000000e+00 : f32
    %30 = vector.broadcast %cst_14 : f32 to vector<8x128xf32>
    %31 = arith.maximumf %29, %30 : vector<8x128xf32>
    %32 = arith.truncf %31 : vector<8x128xf32> to vector<8x128xbf16>
    %c0_15 = arith.constant 0 : index
    %c0_16 = arith.constant 0 : index
    %33 = vector.load %arg6[%c0_15, %c0_16] : memref<128x128xbf16, #tpu.memory_space<vmem>>, vector<128x128xbf16>
    %cst_17 = arith.constant dense<0.000000e+00> : vector<8x128xf32>
    %34 = tpu.matmul %32, %33, %cst_17 {dimension_numbers = #tpu.dot_dimension_numbers<[1], [0], [0], [1], [0, 0, 1, 1], [], []>} : vector<8x128xbf16>, vector<128x128xbf16>, vector<8x128xf32> -> vector<8x128xf32>
    %c0_18 = arith.constant 0 : index
    %c0_19 = arith.constant 0 : index
    %35 = vector.load %arg7[%c0_18, %c0_19] : memref<1x128xf32, #tpu.memory_space<vmem>>, vector<1x128xf32>
    %36 = vector.broadcast %35 : vector<1x128xf32> to vector<8x128xf32>
    %37 = arith.addf %34, %36 : vector<8x128xf32>
    %cst_20 = arith.constant dense<0.000000e+00> : vector<128xf32>
    %38 = vector.multi_reduction <add>, %37, %cst_20 [0] : vector<8x128xf32> to vector<128xf32>
    %39 = vector.shape_cast %38 : vector<128xf32> to vector<1x128xf32>
    %cst_21 = arith.constant 1.250000e-01 : f32
    %40 = vector.broadcast %cst_21 : f32 to vector<1x128xf32>
    %41 = arith.mulf %39, %40 : vector<1x128xf32>
    %42 = arith.mulf %37, %37 : vector<8x128xf32>
    %cst_22 = arith.constant dense<0.000000e+00> : vector<128xf32>
    %43 = vector.multi_reduction <add>, %42, %cst_22 [0] : vector<8x128xf32> to vector<128xf32>
    %44 = vector.shape_cast %43 : vector<128xf32> to vector<1x128xf32>
    %cst_23 = arith.constant 1.250000e-01 : f32
    %45 = vector.broadcast %cst_23 : f32 to vector<1x128xf32>
    %46 = arith.mulf %44, %45 : vector<1x128xf32>
    %47 = arith.mulf %41, %41 : vector<1x128xf32>
    %48 = arith.subf %46, %47 : vector<1x128xf32>
    %49 = vector.broadcast %41 : vector<1x128xf32> to vector<8x128xf32>
    %50 = arith.subf %37, %49 : vector<8x128xf32>
    %cst_24 = arith.constant 9.99999974E-6 : f32
    %51 = vector.broadcast %cst_24 : f32 to vector<1x128xf32>
    %52 = arith.addf %48, %51 : vector<1x128xf32>
    %53 = math.rsqrt %52 : vector<1x128xf32>
    %54 = vector.broadcast %53 : vector<1x128xf32> to vector<8x128xf32>
    %55 = arith.mulf %50, %54 : vector<8x128xf32>
    %c0_25 = arith.constant 0 : index
    %c0_26 = arith.constant 0 : index
    %56 = vector.load %arg8[%c0_25, %c0_26] : memref<1x128xf32, #tpu.memory_space<vmem>>, vector<1x128xf32>
    %57 = vector.broadcast %56 : vector<1x128xf32> to vector<8x128xf32>
    %58 = arith.mulf %55, %57 : vector<8x128xf32>
    %c0_27 = arith.constant 0 : index
    %c0_28 = arith.constant 0 : index
    %59 = vector.load %arg9[%c0_27, %c0_28] : memref<1x128xf32, #tpu.memory_space<vmem>>, vector<1x128xf32>
    %60 = vector.broadcast %59 : vector<1x128xf32> to vector<8x128xf32>
    %61 = arith.addf %58, %60 : vector<8x128xf32>
    %cst_29 = arith.constant 0.000000e+00 : f32
    %62 = vector.broadcast %cst_29 : f32 to vector<8x128xf32>
    %63 = arith.maximumf %61, %62 : vector<8x128xf32>
    %64 = arith.truncf %63 : vector<8x128xf32> to vector<8x128xbf16>
    %c0_30 = arith.constant 0 : index
    %c0_31 = arith.constant 0 : index
    %65 = vector.load %arg10[%c0_30, %c0_31] : memref<128x128xbf16, #tpu.memory_space<vmem>>, vector<128x128xbf16>
    %cst_32 = arith.constant dense<0.000000e+00> : vector<8x128xf32>
    %66 = tpu.matmul %64, %65, %cst_32 {dimension_numbers = #tpu.dot_dimension_numbers<[1], [0], [0], [1], [0, 0, 1, 1], [], []>} : vector<8x128xbf16>, vector<128x128xbf16>, vector<8x128xf32> -> vector<8x128xf32>
    %c0_33 = arith.constant 0 : index
    %c0_34 = arith.constant 0 : index
    %67 = vector.load %arg11[%c0_33, %c0_34] : memref<1x128xf32, #tpu.memory_space<vmem>>, vector<1x128xf32>
    %68 = vector.broadcast %67 : vector<1x128xf32> to vector<8x128xf32>
    %69 = arith.addf %66, %68 : vector<8x128xf32>
    %cst_35 = arith.constant 0.000000e+00 : f32
    %70 = vector.broadcast %cst_35 : f32 to vector<8x128xf32>
    %71 = arith.maximumf %69, %70 : vector<8x128xf32>
    %c0_36 = arith.constant 0 : index
    %c0_37 = arith.constant 0 : index
    %72 = vector.load %arg12[%c0_36, %c0_37] : memref<8x128xf32, #tpu.memory_space<vmem>>, vector<8x128xf32>
    tpu.vector_store %arg12[%c0_36, %c0_37], %71 {strides = array<i32>} : memref<8x128xf32, #tpu.memory_space<vmem>>, vector<8x128xf32>,
    return
  }
  func.func @transform_0(%arg0: i32) -> (i32, i32) {
    %c0_i32 = arith.constant 0 : i32
    %c0_i32_0 = arith.constant 0 : i32
    %c0_i32_1 = arith.constant 0 : i32
    return %c0_i32, %c0_i32_0 : i32, i32
  }
  func.func @transform_1(%arg0: i32) -> (i32, i32) {
    %c0_i32 = arith.constant 0 : i32
    %c0_i32_0 = arith.constant 0 : i32
    %c0_i32_1 = arith.constant 0 : i32
    return %c0_i32, %c0_i32_0 : i32, i32
  }
  func.func @transform_2(%arg0: i32) -> (i32, i32) {
    %c0_i32 = arith.constant 0 : i32
    %c0_i32_0 = arith.constant 0 : i32
    %c0_i32_1 = arith.constant 0 : i32
    return %c0_i32, %c0_i32_0 : i32, i32
  }
  func.func @transform_3(%arg0: i32) -> (i32, i32) {
    %c0_i32 = arith.constant 0 : i32
    %c0_i32_0 = arith.constant 0 : i32
    %c0_i32_1 = arith.constant 0 : i32
    return %c0_i32, %c0_i32_0 : i32, i32
  }
  func.func @transform_4(%arg0: i32) -> (i32, i32) {
    %c0_i32 = arith.constant 0 : i32
    %c0_i32_0 = arith.constant 0 : i32
    %c0_i32_1 = arith.constant 0 : i32
    return %c0_i32, %c0_i32_0 : i32, i32
  }
  func.func @transform_5(%arg0: i32) -> (i32, i32) {
    %c0_i32 = arith.constant 0 : i32
    %c0_i32_0 = arith.constant 0 : i32
    %c0_i32_1 = arith.constant 0 : i32
    return %c0_i32, %c0_i32_0 : i32, i32
  }
  func.func @transform_6(%arg0: i32) -> (i32, i32) {
    %c0_i32 = arith.constant 0 : i32
    %c0_i32_0 = arith.constant 0 : i32
    %c0_i32_1 = arith.constant 0 : i32
    return %c0_i32, %c0_i32_0 : i32, i32
  }
  func.func @transform_7(%arg0: i32) -> (i32, i32) {
    %c0_i32 = arith.constant 0 : i32
    %c0_i32_0 = arith.constant 0 : i32
    %c0_i32_1 = arith.constant 0 : i32
    return %c0_i32, %c0_i32_0 : i32, i32
  }
  func.func @transform_8(%arg0: i32) -> (i32, i32) {
    %c0_i32 = arith.constant 0 : i32
    %c0_i32_0 = arith.constant 0 : i32
    %c0_i32_1 = arith.constant 0 : i32
    return %c0_i32, %c0_i32_0 : i32, i32
  }
  func.func @transform_9(%arg0: i32) -> (i32, i32) {
    %c0_i32 = arith.constant 0 : i32
    %c0_i32_0 = arith.constant 0 : i32
    %c0_i32_1 = arith.constant 0 : i32
    return %c0_i32, %c0_i32_0 : i32, i32
  }
  func.func @transform_10(%arg0: i32) -> (i32, i32) {
    %c0_i32 = arith.constant 0 : i32
    %c0_i32_0 = arith.constant 0 : i32
    %c0_i32_1 = arith.constant 0 : i32
    return %c0_i32, %c0_i32_0 : i32, i32
  }
  func.func @transform_11(%arg0: i32) -> (i32, i32) {
    %c0_i32 = arith.constant 0 : i32
    %c0_i32_0 = arith.constant 0 : i32
    %c0_i32_1 = arith.constant 0 : i32
    return %c0_i32, %c0_i32_0 : i32, i32
  }
}

</mosaic_0001>

<bundles_post_ra>
// kernel: tpu_custom_call.1
= control target key start
LH: loop header
LB: loop body
LE: loop exit
PB: predicated region body
PF: predicated region fallthrough
CT: control target
= control target key end

     0   :  { %16 = vsyncpa [#allocation3], 0  ;;  %s746_s0 = inlined_call_operand.hbm [shape: bf16[8,32], index: 0, kind: input, shape index: {}]   ;;  %s747_s1 = inlined_call_operand.hbm [shape: bf16[32,128], index: 1, kind: input, shape index: {}]   ;;  %s748_s2 = inlined_call_operand.vmem [shape: f32[1,128], index: 2, kind: input, shape index: {}]   ;;  %s749_s3 = inlined_call_operand.vmem [shape: f32[1,128], index: 3, kind: input, shape index: {}]   ;;  %s750_s4 = inlined_call_operand.vmem [shape: f32[1,128], index: 4, kind: input, shape index: {}]   ;;  %s751_s5 = inlined_call_operand.hbm [shape: bf16[128,128], index: 5, kind: input, shape index: {}]   ;;  %s752_s6 = inlined_call_operand.vmem [shape: f32[1,128], index: 6, kind: input, shape index: {}]   ;;  %s753_s7 = inlined_call_operand.vmem [shape: f32[1,128], index: 7, kind: input, shape index: {}]   ;;  %s754_s8 = inlined_call_operand.vmem [shape: f32[1,128], index: 8, kind: input, shape index: {}]   ;;  %s755_s9 = inlined_call_operand.hbm [shape: bf16[128,128], index: 9, kind: input, shape index: {}]   ;;  %s756_s10 = inlined_call_operand.vmem [shape: f32[1,128], index: 10, kind: input, shape index: {}]   ;;  %s757_s11 = inlined_call_operand.hbm [shape: f32[8,128], index: 11, kind: output, shape index: {}]  }
   0x1   :  { %17 = vsyncpa [#allocation6], 0 }
   0x2   :  { %18 = vsyncpa [#allocation9], 0  ;;  %s35_s19 = sshll.u32 %s747_s1, 4  ;;  %s36_s19 = int_to_ptr.hbm [resolvable:$true] %s35_s19 }
   0x3   :  { %19 = vsyncpa [#allocation4], 0  ;;  %s643_s20 = smov [#allocation5]   ;;  %s25_s24 = sshll.u32 %s746_s0, 4  ;;  %s26_s24 = int_to_ptr.hbm [resolvable:$true] %s25_s24 }
   0x4   :  { %s37_s21 = sshll.u32 %s643_s20, 4  ;;  %s644_s25 = smov 64   ;;  %s38_s21 = int_to_ptr.vmem [resolvable:$true] %s37_s21 }
   0x5   :  { %s645_s26 = smov 4   ;;  %s646_s27 = smov [#allocation2]  }
   0x6   :  { %43 = dma.hbm_to_vmem [thread:$0]  %s36_s19, 256, %s38_s21, [#allocation6], %s644_s25, %s644_s25, %s645_s26  }
   0x7   :  { %s27_s28 = sshll.u32 %s646_s27, 4  ;;  %s54_s12 = sshll.u32 %s751_s5, 4  ;;  %s28_s28 = int_to_ptr.vmem [resolvable:$true] %s27_s28  ;;  %s55_s12 = int_to_ptr.hbm [resolvable:$true] %s54_s12 }
   0x8   :  { %30 = dma.hbm_to_vmem [thread:$0]  %s26_s24, 64, %s28_s28, [#allocation3]  }
   0x9   :  { %s73_s14 = sshll.u32 %s755_s9, 4  ;;  %s647_s15 = smov [#allocation7]   ;;  %s74_s14 = int_to_ptr.hbm [resolvable:$true] %s73_s14 }
   0xa   :  { %s56_s16 = sshll.u32 %s647_s15, 4  ;;  %s648_s0 = smov [#allocation8]   ;;  %s57_s16 = int_to_ptr.vmem [resolvable:$true] %s56_s16 }
   0xb   :  { %62 = dma.hbm_to_vmem [thread:$0]  %s55_s12, 1024, %s57_s16, [#allocation6], %s644_s25, %s644_s25, %s645_s26  }
   0xc   :  { %s75_s17 = sshll.u32 %s648_s0, 4  ;;  %s76_s17 = int_to_ptr.vmem [resolvable:$true] %s75_s17 }
   0xd   :  { %81 = dma.hbm_to_vmem [thread:$0]  %s74_s14, 1024, %s76_s17, [#allocation9], %s644_s25, %s644_s25, %s645_s26  }
   0xe   :  { %635 = dma.done.wait [#allocation3], 64  }
   0xf   :  { %636 = vsyncadd [#allocation3], 4294967232 }
  0x10   :  { %637 = dma.done.wait [#allocation6], 1280  }
  0x11   :  { %638 = vsyncadd [#allocation6], 4294966016 }
  0x12   :  { %639 = dma.done.wait [#allocation9], 1024  }
  0x13   :  { %640 = vsyncadd [#allocation9], 4294966272  ;;  %v480_v0 = vld [vmem:[#allocation5 + $0x8] sm:$0xff]  ;;  %v479_v1 = vld [vmem:[#allocation5] sm:$0xff]  ;;  %vm122_vm0 = vcmask 261120   ;;  %s649_s26 = smov [#allocation10]  }
  0x14   :  { %132 = vmatpush.bf16.msra.mxu0 %v480_v0  ;;  %v101_v2 = vld [vmem:[#allocation2] sm:$0xf]  ;;  %v488_v3 = vld [vmem:[#allocation7 + $0x38] sm:$0xff]  ;;  %v487_v4 = vld [vmem:[#allocation7 + $0x30] sm:$0xff]  ;;  %s392_s27 = sshll.u32 %s649_s26, 4  ;;  %s394_s29 = sshll.u32 %s757_s11, 4  ;;  %s393_s27 = int_to_ptr.vmem [resolvable:$true] %s392_s27  ;;  %s395_s29 = int_to_ptr.hbm [resolvable:$true] %s394_s29 }
  0x15   :  { %249 = vmatpush.bf16.msra.mxu1 %v488_v3  ;;  %v486_v5 = vld [vmem:[#allocation7 + $0x28] sm:$0xff]  ;;  %v485_v6 = vld [vmem:[#allocation7 + $0x20] sm:$0xff]  ;;  %v484_v8 = vld [vmem:[#allocation7 + $0x18] sm:$0xff] }
  0x16   :  { %v504_v7 = vld [vmem:[%s748_s2] ss:$0 sm:$0xff]  ;;  %v483_v13 = vld [vmem:[#allocation7 + $0x10] sm:$0xff]  ;;  %v481_v24 = vld [vmem:[#allocation7] sm:$0xff] }
  0x17   :  { %v482_v18 = vld [vmem:[#allocation7 + $0x8] sm:$0xff]  ;;  %v496_v48 = vld [vmem:[#allocation8 + $0x38] sm:$0xff]  ;;  %v495_v49 = vld [vmem:[#allocation8 + $0x30] sm:$0xff] }
  0x18   :  { %133 = vmatpush.bf16.msra.mxu0 %v479_v1  ;;  %v505_v40 = vld [vmem:[%s749_s3] ss:$0 sm:$0xff]  ;;  %372 = vmatpush.bf16.msra.mxu2 %v496_v48  ;;  %v493_v51 = vld [vmem:[#allocation8 + $0x20] sm:$0xff]  ;;  %v492_v53 = vld [vmem:[#allocation8 + $0x18] sm:$0xff] }
  0x19   :  { %250 = vmatpush.bf16.msra.mxu1 %v487_v4  ;;  %v506_v43 = vld [vmem:[%s750_s4] ss:$0 sm:$0xff]  ;;  %v491_v58 = vld [vmem:[#allocation8 + $0x10] sm:$0xff] }
  0x1a   :  { %v494_v50 = vld [vmem:[#allocation8 + $0x28] sm:$0xff] }
  0x1b   :  { %414 = vmatmul.msk.bf16.vlgmr.msra.gmra.mxu0 %vm122_vm0, %v101_v2  ;;  %v507_v52 = vld [vmem:[%s752_s6] ss:$0 sm:$0xff] }
  0x1c   :  { %373 = vmatpush.bf16.msra.mxu2 %v495_v49  ;;  %v490_v63 = vld [vmem:[#allocation8 + $0x8] sm:$0xff] }
  0x1d   :  { %251 = vmatpush.bf16.msra.mxu1 %v486_v5  ;;  %v489_v5 = vld [vmem:[#allocation8] sm:$0xff] }
  0x20   :  { %374 = vmatpush.bf16.msra.mxu2 %v494_v50 }
  0x21   :  { %252 = vmatpush.bf16.msra.mxu1 %v485_v6 }
  0x24   :  { %375 = vmatpush.bf16.msra.mxu2 %v493_v51 }
  0x25   :  { %253 = vmatpush.bf16.msra.mxu1 %v484_v8 }
  0x28   :  { %376 = vmatpush.bf16.msra.mxu2 %v492_v53 }
  0x29   :  { %254 = vmatpush.bf16.msra.mxu1 %v483_v13 }
  0x2c   :  { %377 = vmatpush.bf16.msra.mxu2 %v491_v58 }
  0x2d   :  { %255 = vmatpush.bf16.msra.mxu1 %v482_v18 }
  0x30   :  { %378 = vmatpush.bf16.msra.mxu2 %v490_v63 }
  0x31   :  { %256 = vmatpush.bf16.msra.mxu1 %v481_v24  ;;  %v509_v24 = vld [vmem:[%s754_s8] ss:$0 sm:$0xff] }
  0x34   :  { %379 = vmatpush.bf16.msra.mxu2 %v489_v5 }
  0x98   :  { %v135_v9 = vpop.f32.mrf.mxu0 }
  0x99   :  { %v136_v10 = vadd.f32 %v504_v7, %v135_v9 }
  0x9b   :  { %v139_v11 = vrot.slane %v136_v10, 4  ;;  %v146_v12 = vmul.f32 %v136_v10, %v136_v10 }
  0x9d   :  { %v140_v14 = vadd.f32 %v139_v11, %v136_v10  ;;  %v147_v15 = vrot.slane %v146_v12, 4 }
  0x9f   :  { %v141_v16 = vrot.slane %v140_v14, 2  ;;  %v148_v17 = vadd.f32 %v147_v15, %v146_v12 }
  0xa0   :  { %v137_v19 = vpop.f32.mrf.mxu0 }
  0xa1   :  { %v142_v20 = vadd.f32 %v141_v16, %v140_v14  ;;  %v149_v21 = vrot.slane %v148_v17, 2 }
  0xa3   :  { %v143_v22 = vrot.slane %v142_v20, 1  ;;  %v150_v23 = vadd.f32 %v149_v21, %v148_v17  ;;  %v508_v21 = vld [vmem:[%s753_s7] ss:$0 sm:$0xff] }
  0xa5   :  { %v151_v25 = vrot.slane %v150_v23, 1  ;;  %v144_v26 = vadd.f32 %v143_v22, %v142_v20 }
  0xa7   :  { %v152_v27 = vadd.f32 %v151_v25, %v150_v23  ;;  %v145_v28 = vmul.f32 0.125, %v144_v26 }
  0xa9   :  { %v153_v29 = vmul.f32 0.125, %v152_v27  ;;  %v154_v30 = vmul.f32 %v145_v28, %v145_v28  ;;  %v156_v39 = vsub.f32 %v136_v10, %v145_v28 }
  0xab   :  { %v155_v31 = vsub.f32 %v153_v29, %v154_v30  ;;  %v510_v29 = vld [vmem:[%s756_s10] ss:$0 sm:$0xff] }
  0xad   :  { %v157_v32 = vadd.f32 1e-05, %v155_v31 }
  0xaf   :  { %511 = vrsqrt.f32 %v157_v32  ;;  %vm164_vm2 = vweird.f32 %v157_v32 }
  0xb5   :  { %v512_v33 = vpop.eup %511 }
  0xb6   :  { %v159_v34 = vmul.f32 %v512_v33, %v157_v32  ;;  %vm165_vm1 = vweird.f32 %v512_v33 }
  0xb7   :  { %vm166_vm3 = vmor %vm164_vm2, %vm165_vm1 }
  0xb8   :  { %v160_v35 = vmul.f32 %v512_v33, %v159_v34 }
  0xba   :  { %v161_v36 = vmul.f32 0.5, %v160_v35 }
  0xbc   :  { %v162_v37 = vsub.f32 1.5, %v161_v36 }
  0xbe   :  { %v163_v38 = vmul.f32 %v512_v33, %v162_v37 }
  0xc0   :  { %v167_v41 = vsel %vm166_vm3, %v512_v33, %v163_v38 }
  0xc1   :  { %v168_v42 = vmul.f32 %v167_v41, %v156_v39 }
  0xc3   :  { %v173_v44 = vmul.f32 %v505_v40, %v168_v42 }
  0xc5   :  { %v178_v45 = vadd.f32 %v506_v43, %v173_v44 }
  0xc7   :  { %v179_v46 = vmax.f32 %v178_v45, 0.0 }
  0xc9   :  { %v180_v47 = vpack.c.bf16 %v179_v46, %v179_v46 }
  0xcb   :  { %257 = vmatmul.bf16.vlgmr.msra.gmra.mxu1 %v180_v47 }
 0x148   :  { %v258_v54 = vpop.f32.mrf.mxu1 }
 0x149   :  { %v259_v55 = vadd.f32 %v507_v52, %v258_v54 }
 0x14b   :  { %v262_v56 = vrot.slane %v259_v55, 4  ;;  %v269_v57 = vmul.f32 %v259_v55, %v259_v55 }
 0x14d   :  { %v263_v59 = vadd.f32 %v262_v56, %v259_v55  ;;  %v270_v60 = vrot.slane %v269_v57, 4 }
 0x14f   :  { %v264_v61 = vrot.slane %v263_v59, 2  ;;  %v271_v62 = vadd.f32 %v270_v60, %v269_v57 }
 0x150   :  { %v260_v0 = vpop.f32.mrf.mxu1 }
 0x151   :  { %v265_v1 = vadd.f32 %v264_v61, %v263_v59  ;;  %v272_v2 = vrot.slane %v271_v62, 2 }
 0x153   :  { %v266_v3 = vrot.slane %v265_v1, 1  ;;  %v273_v4 = vadd.f32 %v272_v2, %v271_v62 }
 0x155   :  { %v274_v6 = vrot.slane %v273_v4, 1  ;;  %v267_v7 = vadd.f32 %v266_v3, %v265_v1 }
 0x157   :  { %v275_v8 = vadd.f32 %v274_v6, %v273_v4  ;;  %v268_v9 = vmul.f32 0.125, %v267_v7 }
 0x159   :  { %v276_v10 = vmul.f32 0.125, %v275_v8  ;;  %v277_v11 = vmul.f32 %v268_v9, %v268_v9  ;;  %v279_v20 = vsub.f32 %v259_v55, %v268_v9 }
 0x15b   :  { %v278_v12 = vsub.f32 %v276_v10, %v277_v11 }
 0x15d   :  { %v280_v13 = vadd.f32 1e-05, %v278_v12 }
 0x15f   :  { %513 = vrsqrt.f32 %v280_v13  ;;  %vm287_vm5 = vweird.f32 %v280_v13 }
 0x165   :  { %v514_v14 = vpop.eup %513 }
 0x166   :  { %v282_v15 = vmul.f32 %v514_v14, %v280_v13  ;;  %vm288_vm4 = vweird.f32 %v514_v14 }
 0x167   :  { %vm289_vm6 = vmor %vm287_vm5, %vm288_vm4 }
 0x168   :  { %v283_v16 = vmul.f32 %v514_v14, %v282_v15 }
 0x16a   :  { %v284_v17 = vmul.f32 0.5, %v283_v16 }
 0x16c   :  { %v285_v18 = vsub.f32 1.5, %v284_v17 }
 0x16e   :  { %v286_v19 = vmul.f32 %v514_v14, %v285_v18 }
 0x170   :  { %v290_v22 = vsel %vm289_vm6, %v514_v14, %v286_v19 }
 0x171   :  { %v291_v23 = vmul.f32 %v290_v22, %v279_v20 }
 0x173   :  { %v296_v25 = vmul.f32 %v508_v21, %v291_v23 }
 0x175   :  { %v301_v26 = vadd.f32 %v509_v24, %v296_v25 }
 0x177   :  { %v302_v27 = vmax.f32 %v301_v26, 0.0 }
 0x179   :  { %v303_v28 = vpack.c.bf16 %v302_v27, %v302_v27 }
 0x17b   :  { %380 = vmatmul.bf16.vlgmr.msra.gmra.mxu2 %v303_v28 }
 0x1fe   :  { %v381_v30 = vpop.f32.mrf.mxu2 }
 0x1ff   :  { %v382_v31 = vadd.f32 %v510_v29, %v381_v30 }
 0x201   :  { %v385_v32 = vmax.f32 %v382_v31, 0.0 }
 0x203   :  { %386 = vst [vmem:[#allocation10] sm:$0xff] %v385_v32 }
 0x204   :  { %397 = dma.vmem_to_hbm [thread:$0]  %s393_s27, 128, %s395_s29, [#allocation4]  }
 0x206   :  { %v383_v33 = vpop.f32.mrf.mxu2 }
 0x207   :  { %641 = dma.done.wait [#allocation4], 128  }
 0x208   :  { %642 = vsyncadd [#allocation4], 4294967168 }
 0x209   :  { %402 = vsyncpa [#allocation3], 1 }
 0x20a   :  { %403 = vsyncpa [#allocation6], 1 }
 0x20b   :  { %404 = vsyncpa [#allocation9], 1 }
 0x20c   :  { %405 = vsyncpa [#allocation4], 1 }

</bundles_post_ra>
